<compile_context>
chip_gen: v7x
topology: tpu7x:2x2x1
jax: 0.10.0
libtpu: 0.0.40
codegen_flags: <defaults>
</compile_context>

<pallas_src>
import numpy as np
import jax
import jax.numpy as jnp
from jax.experimental import pallas as pl
from jax.experimental.pallas import tpu as pltpu


# ----------------------- config helpers (mirror the PyTorch __init__) -----------------------

def conv_out_len(seq_len, ker_size, stride, padding, dilation, stack):
    for _ in range(stack):
        seq_len = int((seq_len + 2 * padding - dilation * (ker_size - 1) - 1) / stride + 1)
    return seq_len


def deconv_output_paddings(seq_len, num_blocks, kernel_size, stride, padding):
    if stride > 1:
        out_pad = []
        seq = seq_len
        for _ in range(num_blocks):
            out_pad.append(seq % 2)
            seq = conv_out_len(seq, kernel_size, stride, padding, 1, 1)
        if kernel_size % 2 == 1:
            out_pad = [1 - x for x in out_pad[::-1]]
        else:
            out_pad = out_pad[::-1]
    else:
        out_pad = [0] * num_blocks
    return out_pad


def deconv_out_len(lin, kernel_size, stride, padding, output_padding):
    return (lin - 1) * stride - 2 * padding + (kernel_size - 1) + output_padding + 1


def _round_up(x, m):
    return ((x + m - 1) // m) * m


# ------------------- host-side folding of the decoder into an affine chain ------------------
# Weight-only, one-time re-packing.  Activations are flattened as (length, channel) -> l*C + c.

def build_affine_chain(wlin, blin, conv_params, wc, bc, *,
                       embedding_dim, compressed_len, kernel_size, stride, padding, out_pads):
    """Returns ([(A (Din,Dout), b (Dout,), apply_relu)], final_length)."""
    maps = []
    E, L0, K = embedding_dim, compressed_len, kernel_size

    # upsample: nn.Linear(1, L0) applied to (B, E, 1): h[b, l*E + e] = x[b,e] * W[l,0] + bias[l]
    wlin = np.asarray(wlin, np.float32)            # (L0, 1)  PyTorch Linear weight
    blin = np.asarray(blin, np.float32)            # (L0,)
    A0 = np.zeros((E, L0 * E), np.float32)
    b0 = np.zeros((L0 * E,), np.float32)
    for l in range(L0):
        A0[np.arange(E), l * E + np.arange(E)] = wlin[l, 0]
        b0[l * E:(l + 1) * E] = blin[l]
    maps.append((A0, b0, False))

    # stacked ConvTranspose1d + ReLU blocks
    # out[b, lo, co] = bias[co] + sum_{ci, li, k : lo = li*stride - padding + k} h[b, li, ci] * w[ci, co, k]
    # TODO(synk): nn.Dropout is stochastic in train mode; implemented as eval-mode identity.
    lin, cin = L0, E
    for (w, b), op in zip(conv_params, out_pads):
        w = np.asarray(w, np.float32)              # (Ci, Co, K)  PyTorch ConvTranspose1d layout
        b = np.asarray(b, np.float32)              # (Co,)
        cout = w.shape[1]
        lout = deconv_out_len(lin, K, stride, padding, op)
        A = np.zeros((lin * cin, lout * cout), np.float32)
        bv = np.zeros((lout * cout,), np.float32)
        for li in range(lin):
            for k in range(K):
                lo = li * stride - padding + k
                if 0 <= lo < lout:
                    A[li * cin:(li + 1) * cin, lo * cout:(lo + 1) * cout] += w[:, :, k]
        for lo in range(lout):
            bv[lo * cout:(lo + 1) * cout] = b
        maps.append((A, bv, True))
        lin, cin = lout, cout

    # head: Conv1d(C, O, kernel=1) fused with the final transpose(2, 1)
    wc = np.asarray(wc, np.float32)                # (O, C, 1)  PyTorch Conv1d layout
    bc = np.asarray(bc, np.float32)                # (O,)
    O = wc.shape[0]
    w2 = wc[:, :, 0].T                             # (C, O)
    A = np.zeros((lin * cin, lin * O), np.float32)
    bv = np.zeros((lin * O,), np.float32)
    for l in range(lin):
        A[l * cin:(l + 1) * cin, l * O:(l + 1) * O] = w2
        bv[l * O:(l + 1) * O] = bc
    maps.append((A, bv, False))
    return maps, lin


def compose_relu_free(maps):
    """Fold any stage that is NOT followed by a ReLU into its successor (host-side compose)."""
    out = []
    for A, b, relu in maps:
        if out and not out[-1][2]:                 # previous stage had no ReLU -> compose
            Ap, bp, _ = out.pop()
            out.append((Ap @ A, bp @ A + b, relu))
        else:
            out.append((A, b, relu))
    return out


def pack_chain(maps, d_pad):
    """Pack all stages into one zero-padded square slab + explicit bias rows."""
    n = len(maps)
    slab = np.zeros((n, d_pad, d_pad), np.float32)
    bias = np.zeros((n, 1, d_pad), np.float32)
    relus = []
    for j, (A, b, relu) in enumerate(maps):
        din, dout = A.shape
        slab[j, :din, :dout] = A                   # zero padding contributes zeros
        bias[j, 0, :dout] = b                      # padded lanes get bias 0 -> stay 0
        relus.append(relu)
    return slab, bias, tuple(relus)


# ----------------------------------------- kernel -------------------------------------------

def make_decoder_kernel(relus):
    n_stages = len(relus)

    def kernel(x_ref, w_ref, b_ref, o_ref):
        h = x_ref[...]                                         # (bb, Dpad), lane-dense fp32
        for j in range(n_stages):                              # statically unrolled: one dot/stage
            h = jnp.dot(h, w_ref[j], preferred_element_type=jnp.float32)   # full aligned plane
            h = h + b_ref[j]                                   # broadcast bias add (VPU slot)
            if relus[j]:
                h = jnp.maximum(h, 0.0)
        o_ref[...] = h                                         # unmasked lane-dense store

    return kernel


# -------------------------------- factory: fold once, jit forward ---------------------------

def make_conv_decoder(wlin, blin, conv_params, wc, bc, *,
                      embedding_dim, seq_len, out_dimension, kernel_size, stride, padding):
    num_blocks = len(conv_params)
    compressed_len = conv_out_len(seq_len, kernel_size, stride, padding, 1, num_blocks)
    out_pads = deconv_output_paddings(seq_len, num_blocks, kernel_size, stride, padding)

    maps, L = build_affine_chain(wlin, blin, conv_params, wc, bc,
                                 embedding_dim=embedding_dim, compressed_len=compressed_len,
                                 kernel_size=kernel_size, stride=stride,
                                 padding=padding, out_pads=out_pads)
    maps = compose_relu_free(maps)                 # upsample Linear folded into first deconv

    dims = [embedding_dim] + [A.shape[1] for A, _, _ in maps]
    d_pad = _round_up(max(max(dims), 8), 128)      # common square plane, (8,128)-aligned
    slab_np, bias_np, relus = pack_chain(maps, d_pad)
    slab = jax.device_put(jnp.asarray(slab_np))    # uploaded once, reused every call
    bias = jax.device_put(jnp.asarray(bias_np))

    O = int(np.asarray(wc).shape[0])
    n_stages = len(relus)
    kernel = make_decoder_kernel(relus)

    # generation-aware batch tiling: single grid step on 1-TC chips (v5e/v6e); two balanced
    # blocks on 2-TC chips (v7x) so the "parallel" axis shards across both TensorCores.
    try:
        kind = jax.devices()[0].device_kind.lower()
    except Exception:
        kind = ""
    two_tc = "v7" in kind

    @jax.jit
    def forward(x):
        B = x.shape[0]
        x2 = x[:, :, 0].astype(jnp.float32)
        x_pad = jnp.pad(x2, ((0, 0), (0, d_pad - embedding_dim)))          # (B, Dpad)

        if two_tc and B >= 16 and (B // 2) % 8 == 0:
            bb = B // 2                                                     # 2 balanced blocks
        else:
            bb = B                                                          # whole batch, 1 step
        grid = (B // bb,)

        flops = 2 * B * n_stages * d_pad * d_pad
        bytes_accessed = 4 * (B * d_pad * 2 + int(slab.size) + int(bias.size))

        out_flat = pl.pallas_call(
            kernel,
            out_shape=jax.ShapeDtypeStruct((B, d_pad), jnp.float32),
            grid_spec=pltpu.PrefetchScalarGridSpec(
                num_scalar_prefetch=0,
                grid=grid,
                in_specs=[pl.BlockSpec((bb, d_pad), lambda i: (i, 0)),
                          pl.BlockSpec(slab.shape, lambda i: (0, 0, 0)),    # grid-invariant
                          pl.BlockSpec(bias.shape, lambda i: (0, 0, 0))],   # grid-invariant
                out_specs=pl.BlockSpec((bb, d_pad), lambda i: (i, 0))),
            compiler_params=pltpu.CompilerParams(dimension_semantics=("parallel",)),
            cost_estimate=pl.CostEstimate(flops=int(flops), transcendentals=0,
                                          bytes_accessed=int(bytes_accessed)),
        )(x_pad, slab, bias)

        # drop padded lanes and unflatten (length, out_dim) outside the kernel (free layout op)
        return out_flat[:, :L * O].reshape(B, L, O)

    return forward


# ------------------------------- pure-JAX reference (for sanity) ----------------------------

def conv_decoder_reference(x, wlin, blin, conv_params, wc, bc, *, stride, padding, out_pads):
    h = jnp.einsum('bei,li->bel', x, wlin) + blin[None, None, :]       # Linear(1, L0): (B, E, L0)
    for (w, b), op in zip(conv_params, out_pads):
        K = w.shape[2]
        wf = jnp.flip(w, axis=2).transpose(1, 0, 2)                    # (Co, Ci, K)
        pad_lo = K - 1 - padding
        pad_hi = K - 1 - padding + op
        h = jax.lax.conv_general_dilated(
            h, wf, window_strides=(1,), padding=[(pad_lo, pad_hi)],
            lhs_dilation=(stride,), rhs_dilation=(1,),
            dimension_numbers=("NCH", "OIH", "NCH"))
        h = jnp.maximum(h + b.reshape(1, -1, 1), 0.0)
    out = jnp.einsum('ock,bcl->bol', wc, h) + bc.reshape(1, -1, 1)     # Conv1d 1x1
    return jnp.transpose(out, (0, 2, 1))                               # (B, L, O)


# --------------------------------------------- main -----------------------------------------

if __name__ == "__main__":
    batch = 2
    embedding_dim = 8
    num_channels = [4, 6]          # as passed to ConvDecoder; reversed internally -> [6, 4]
    seq_len = 16
    out_dimension = 5
    kernel_size = 3
    stride = 2
    padding = 0

    channels = num_channels[::-1]  # [6, 4]
    num_blocks = len(channels)
    compressed_len = conv_out_len(seq_len, kernel_size, stride, padding, 1, num_blocks)
    out_pads = deconv_output_paddings(seq_len, num_blocks, kernel_size, stride, padding)

    key = jax.random.PRNGKey(0)
    keys = iter(jax.random.split(key, 16))
    scale = 0.1

    # parameters in native PyTorch layouts
    wlin = scale * jax.random.normal(next(keys), (compressed_len, 1), jnp.float32)   # Linear(1, L0).weight
    blin = scale * jax.random.normal(next(keys), (compressed_len,), jnp.float32)     # Linear(1, L0).bias

    conv_params = []
    in_ch = embedding_dim
    for out_ch in channels:
        w = scale * jax.random.normal(next(keys), (in_ch, out_ch, kernel_size), jnp.float32)
        b = scale * jax.random.normal(next(keys), (out_ch,), jnp.float32)
        conv_params.append((w, b))
        in_ch = out_ch

    wc = scale * jax.random.normal(next(keys), (out_dimension, channels[-1], 1), jnp.float32)  # Conv1d(C, O, 1).weight
    bc = scale * jax.random.normal(next(keys), (out_dimension,), jnp.float32)                  # Conv1d bias

    x = jax.random.normal(next(keys), (batch, embedding_dim, 1), jnp.float32)                  # (B, E, 1)

    # fold the weights exactly once; returns a jitted forward
    decoder = make_conv_decoder(wlin, blin, conv_params, wc, bc,
                                embedding_dim=embedding_dim, seq_len=seq_len,
                                out_dimension=out_dimension, kernel_size=kernel_size,
                                stride=stride, padding=padding)

    out = decoder(x)
    out = jax.block_until_ready(out)

    ref = conv_decoder_reference(x, wlin, blin, conv_params, wc, bc,
                                 stride=stride, padding=padding, out_pads=out_pads)
    ref = jax.block_until_ready(ref)

    assert out.shape == (batch, seq_len, out_dimension), out.shape
    np.testing.assert_allclose(np.asarray(out), np.asarray(ref), rtol=1e-4, atol=1e-4)
    print("KERNEL_OK")
</pallas_src>

<mosaic_0001>
module attributes {stable_mosaic.version = 11 : i64} {
  func.func @kernel(%arg0: i32, %arg1: memref<2x128xf32, #tpu.memory_space<vmem>>, %arg2: memref<3x128x128xf32, #tpu.memory_space<vmem>>, %arg3: memref<3x1x128xf32, #tpu.memory_space<vmem>>, %arg4: memref<2x128xf32, #tpu.memory_space<vmem>>) attributes {dimension_semantics = [#tpu.dimension_semantics<parallel>], iteration_bounds = array<i64: 1>, scalar_prefetch = 0 : i64, scratch_operands = 0 : i64, tpu.core_type = #tpu.core_type<tc>, window_params = [{transform_indices = @transform_0, window_bounds = array<i64: 2, 128>}, {pipeline_mode = #tpu.pipeline_mode<synchronous>, transform_indices = @transform_1, window_bounds = array<i64: 3, 128, 128>}, {pipeline_mode = #tpu.pipeline_mode<synchronous>, transform_indices = @transform_2, window_bounds = array<i64: 3, 1, 128>}, {transform_indices = @transform_3, window_bounds = array<i64: 2, 128>}]} {
    %c0 = arith.constant 0 : index
    %c0_0 = arith.constant 0 : index
    %0 = vector.load %arg1[%c0, %c0_0] : memref<2x128xf32, #tpu.memory_space<vmem>>, vector<2x128xf32>
    %c0_1 = arith.constant 0 : index
    %c0_2 = arith.constant 0 : index
    %c0_3 = arith.constant 0 : index
    %1 = vector.load %arg2[%c0_1, %c0_2, %c0_3] : memref<3x128x128xf32, #tpu.memory_space<vmem>>, vector<1x128x128xf32>
    %2 = vector.shape_cast %1 : vector<1x128x128xf32> to vector<128x128xf32>
    %cst = arith.constant dense<0.000000e+00> : vector<2x128xf32>
    %3 = tpu.matmul %0, %2, %cst {dimension_numbers = #tpu.dot_dimension_numbers<[1], [0], [0], [1], [0, 0, 1, 1], [], []>} : vector<2x128xf32>, vector<128x128xf32>, vector<2x128xf32> -> vector<2x128xf32>
    %c0_4 = arith.constant 0 : index
    %c0_5 = arith.constant 0 : index
    %c0_6 = arith.constant 0 : index
    %4 = vector.load %arg3[%c0_4, %c0_5, %c0_6] : memref<3x1x128xf32, #tpu.memory_space<vmem>>, vector<1x1x128xf32>
    %5 = vector.shape_cast %4 : vector<1x1x128xf32> to vector<1x128xf32>
    %6 = vector.broadcast %5 : vector<1x128xf32> to vector<2x128xf32>
    %7 = arith.addf %3, %6 : vector<2x128xf32>
    %cst_7 = arith.constant 0.000000e+00 : f32
    %8 = vector.broadcast %cst_7 : f32 to vector<2x128xf32>
    %9 = arith.maximumf %7, %8 : vector<2x128xf32>
    %c1 = arith.constant 1 : index
    %c0_8 = arith.constant 0 : index
    %c0_9 = arith.constant 0 : index
    %10 = vector.load %arg2[%c1, %c0_8, %c0_9] : memref<3x128x128xf32, #tpu.memory_space<vmem>>, vector<1x128x128xf32>
    %11 = vector.shape_cast %10 : vector<1x128x128xf32> to vector<128x128xf32>
    %cst_10 = arith.constant dense<0.000000e+00> : vector<2x128xf32>
    %12 = tpu.matmul %9, %11, %cst_10 {dimension_numbers = #tpu.dot_dimension_numbers<[1], [0], [0], [1], [0, 0, 1, 1], [], []>} : vector<2x128xf32>, vector<128x128xf32>, vector<2x128xf32> -> vector<2x128xf32>
    %c1_11 = arith.constant 1 : index
    %c0_12 = arith.constant 0 : index
    %c0_13 = arith.constant 0 : index
    %13 = vector.load %arg3[%c1_11, %c0_12, %c0_13] : memref<3x1x128xf32, #tpu.memory_space<vmem>>, vector<1x1x128xf32>
    %14 = vector.shape_cast %13 : vector<1x1x128xf32> to vector<1x128xf32>
    %15 = vector.broadcast %14 : vector<1x128xf32> to vector<2x128xf32>
    %16 = arith.addf %12, %15 : vector<2x128xf32>
    %cst_14 = arith.constant 0.000000e+00 : f32
    %17 = vector.broadcast %cst_14 : f32 to vector<2x128xf32>
    %18 = arith.maximumf %16, %17 : vector<2x128xf32>
    %c2 = arith.constant 2 : index
    %c0_15 = arith.constant 0 : index
    %c0_16 = arith.constant 0 : index
    %19 = vector.load %arg2[%c2, %c0_15, %c0_16] : memref<3x128x128xf32, #tpu.memory_space<vmem>>, vector<1x128x128xf32>
    %20 = vector.shape_cast %19 : vector<1x128x128xf32> to vector<128x128xf32>
    %cst_17 = arith.constant dense<0.000000e+00> : vector<2x128xf32>
    %21 = tpu.matmul %18, %20, %cst_17 {dimension_numbers = #tpu.dot_dimension_numbers<[1], [0], [0], [1], [0, 0, 1, 1], [], []>} : vector<2x128xf32>, vector<128x128xf32>, vector<2x128xf32> -> vector<2x128xf32>
    %c2_18 = arith.constant 2 : index
    %c0_19 = arith.constant 0 : index
    %c0_20 = arith.constant 0 : index
    %22 = vector.load %arg3[%c2_18, %c0_19, %c0_20] : memref<3x1x128xf32, #tpu.memory_space<vmem>>, vector<1x1x128xf32>
    %23 = vector.shape_cast %22 : vector<1x1x128xf32> to vector<1x128xf32>
    %24 = vector.broadcast %23 : vector<1x128xf32> to vector<2x128xf32>
    %25 = arith.addf %21, %24 : vector<2x128xf32>
    %c0_21 = arith.constant 0 : index
    %c0_22 = arith.constant 0 : index
    %26 = vector.load %arg4[%c0_21, %c0_22] : memref<2x128xf32, #tpu.memory_space<vmem>>, vector<2x128xf32>
    tpu.vector_store %arg4[%c0_21, %c0_22], %25 {strides = array<i32>} : memref<2x128xf32, #tpu.memory_space<vmem>>, vector<2x128xf32>,
    return
  }
  func.func @transform_0(%arg0: i32) -> (i32, i32) {
    %c0_i32 = arith.constant 0 : i32
    %c0_i32_0 = arith.constant 0 : i32
    return %arg0, %c0_i32 : i32, i32
  }
  func.func @transform_1(%arg0: i32) -> (i32, i32, i32) {
    %c0_i32 = arith.constant 0 : i32
    %c0_i32_0 = arith.constant 0 : i32
    %c0_i32_1 = arith.constant 0 : i32
    %c0_i32_2 = arith.constant 0 : i32
    return %c0_i32, %c0_i32_0, %c0_i32_1 : i32, i32, i32
  }
  func.func @transform_2(%arg0: i32) -> (i32, i32, i32) {
    %c0_i32 = arith.constant 0 : i32
    %c0_i32_0 = arith.constant 0 : i32
    %c0_i32_1 = arith.constant 0 : i32
    %c0_i32_2 = arith.constant 0 : i32
    return %c0_i32, %c0_i32_0, %c0_i32_1 : i32, i32, i32
  }
  func.func @transform_3(%arg0: i32) -> (i32, i32) {
    %c0_i32 = arith.constant 0 : i32
    %c0_i32_0 = arith.constant 0 : i32
    return %arg0, %c0_i32 : i32, i32
  }
}

</mosaic_0001>

<bundles_post_ra>
// kernel: forward.1
= control target key start
LH: loop header
LB: loop body
LE: loop exit
PB: predicated region body
PF: predicated region fallthrough
CT: control target
= control target key end

     0   :  { %8 = vsyncpa [#allocation3], 0  ;;  %s583_s12 = smov [#allocation2]   ;;  %s666_s0 = inlined_call_operand.vmem [shape: f32[2,128], index: 0, kind: input, shape index: {}]   ;;  %s667_s1 = inlined_call_operand.hbm [shape: f32[3,128,128], index: 1, kind: input, shape index: {}]   ;;  %s668_s2 = inlined_call_operand.vmem [shape: f32[3,1,128], index: 2, kind: input, shape index: {}]   ;;  %s669_s3 = inlined_call_operand.vmem [shape: f32[2,128], index: 3, kind: output, shape index: {}]  }
   0x1   :  { %s16_s13 = sshll.u32 %s583_s12, 4  ;;  %s559_s16 = scalar_lea.hbm %s667_s1, 6144  ;;  %s17_s13 = int_to_ptr.vmem [resolvable:$true] %s16_s13 }
   0x2   :  { %p560_p0 = scmp.ne.s32.totalorder %s667_s1, %s559_s16  ;;  %p563_p1 = scmp.lt.u32.totalorder %s559_s16, %s667_s1 }
   0x4   :  { %p565_p2 = pnand %p563_p1, %p560_p0 }
   0x6   :  { %568 = shalt.err (!%p565_p2)
}
   0x7   :  { %s569_s21 = scalar_lea.vmem %s17_s13, 6144  ;;  %p574_p4 = scmp.lt.s32.totalorder %s17_s13, %s17_s13 }
   0x8   :  { %p570_p3 = scmp.ne.s32.totalorder %s17_s13, %s569_s21  ;;  %p575_p5 = scmp.lt.s32.totalorder %s569_s21, %s569_s21 }
   0xa   :  { %p576_p6 = por %p575_p5, %p574_p4 }
   0xc   :  { %p577_p7 = pnand %p576_p6, %p570_p3 }
   0xe   :  { %580 = shalt.err (!%p577_p7)
}
   0xf   :  { %s584_s22 = smov 128   ;;  %s585_s23 = smov 8  }
  0x10   :  { %22 = dma.hbm_to_vmem [thread:$0]  %s667_s1, 6144, %s17_s13, [#allocation3], %s584_s22, %s584_s22, %s585_s23  }
  0x11   :  { %581 = dma.done.wait [#allocation3], 6144  }
  0x12   :  { %582 = vsyncadd [#allocation3], 4294961152  ;;  %v586_v0 = vmov 0.0|0.0   ;;  %vm587_vm0 = vmmov 0   ;;  %v588_v1 = vmov 0.0   ;;  %v29_v2 = vld [vmem:[#allocation2] sm:$0xff] }
  0x13   :  { %481 = vmatprep.subr.bf16.mxu0 %v586_v0  ;;  %408 = vmatprep.mubr.msk.f32.mxu0 %vm587_vm0, %v588_v1  ;;  %v30_v3 = vld [vmem:[#allocation2 + $0x8] sm:$0xff]  ;;  %v31_v4 = vld [vmem:[#allocation2 + $0x10] sm:$0xff]  ;;  %v32_v6 = vld [vmem:[#allocation2 + $0x18] sm:$0xff] }
  0x14   :  { %505 = vmatprep.subr.bf16.mxu1 %v586_v0  ;;  %443 = vmatprep.mubr.msk.f32.mxu1 %vm587_vm0, %v588_v1  ;;  %v482_v5 = vpack.c.bf16 %v30_v3, %v29_v2  ;;  %v485_v7 = vpack.c.bf16 %v32_v6, %v31_v4  ;;  %v33_v8 = vld [vmem:[#allocation2 + $0x20] sm:$0xff]  ;;  %v34_v9 = vld [vmem:[#allocation2 + $0x28] sm:$0xff]  ;;  %v126_v12 = vld [vmem:[#allocation2 + $0x90] sm:$0xff] }
  0x15   :  { %v124_v10 = vld [vmem:[#allocation2 + $0x80] sm:$0xff]  ;;  %v125_v11 = vld [vmem:[#allocation2 + $0x88] sm:$0xff]  ;;  %v127_v13 = vld [vmem:[#allocation2 + $0x98] sm:$0xff]  ;;  %v488_v14 = vpack.c.bf16 %v34_v9, %v33_v8 }
  0x16   :  { %483 = vmatpush3.bf16.msra.mxu0 %v482_v5  ;;  %v506_v15 = vpack.c.bf16 %v125_v11, %v124_v10  ;;  %v35_v16 = vld [vmem:[#allocation2 + $0x30] sm:$0xff]  ;;  %v36_v17 = vld [vmem:[#allocation2 + $0x38] sm:$0xff]  ;;  %v509_v18 = vpack.c.bf16 %v127_v13, %v126_v12  ;;  %v128_v19 = vld [vmem:[#allocation2 + $0xa0] sm:$0xff] }
  0x17   :  { %484 = vmatprep.subr.bf16.mxu0 %v586_v0  ;;  %v129_v20 = vld [vmem:[#allocation2 + $0xa8] sm:$0xff]  ;;  %v491_v21 = vpack.c.bf16 %v36_v17, %v35_v16  ;;  %v37_v22 = vld [vmem:[#allocation2 + $0x40] sm:$0xff]  ;;  %v130_v25 = vld [vmem:[#allocation2 + $0xb0] sm:$0xff] }
  0x18   :  { %507 = vmatpush3.bf16.msra.mxu1 %v506_v15  ;;  %v38_v23 = vld [vmem:[#allocation2 + $0x48] sm:$0xff]  ;;  %v512_v24 = vpack.c.bf16 %v129_v20, %v128_v19  ;;  %v131_v26 = vld [vmem:[#allocation2 + $0xb8] sm:$0xff]  ;;  %v39_v28 = vld [vmem:[#allocation2 + $0x50] sm:$0xff] }
  0x19   :  { %508 = vmatprep.subr.bf16.mxu1 %v586_v0  ;;  %v494_v27 = vpack.c.bf16 %v38_v23, %v37_v22  ;;  %v40_v29 = vld [vmem:[#allocation2 + $0x58] sm:$0xff]  ;;  %v515_v30 = vpack.c.bf16 %v131_v26, %v130_v25  ;;  %v132_v31 = vld [vmem:[#allocation2 + $0xc0] sm:$0xff]  ;;  %v133_v32 = vld [vmem:[#allocation2 + $0xc8] sm:$0xff] }
  0x1a   :  { %486 = vmatpush3.bf16.msra.mxu0 %v485_v7  ;;  %v497_v33 = vpack.c.bf16 %v40_v29, %v39_v28  ;;  %v41_v34 = vld [vmem:[#allocation2 + $0x60] sm:$0xff]  ;;  %v42_v35 = vld [vmem:[#allocation2 + $0x68] sm:$0xff]  ;;  %v518_v36 = vpack.c.bf16 %v133_v32, %v132_v31  ;;  %v134_v37 = vld [vmem:[#allocation2 + $0xd0] sm:$0xff] }
  0x1b   :  { %487 = vmatprep.subr.bf16.mxu0 %v586_v0  ;;  %v135_v38 = vld [vmem:[#allocation2 + $0xd8] sm:$0xff]  ;;  %v500_v39 = vpack.c.bf16 %v42_v35, %v41_v34  ;;  %v43_v40 = vld [vmem:[#allocation2 + $0x70] sm:$0xff]  ;;  %v136_v43 = vld [vmem:[#allocation2 + $0xe0] sm:$0xff] }
  0x1c   :  { %510 = vmatpush3.bf16.msra.mxu1 %v509_v18  ;;  %v44_v41 = vld [vmem:[#allocation2 + $0x78] sm:$0xff]  ;;  %v521_v42 = vpack.c.bf16 %v135_v38, %v134_v37  ;;  %v137_v44 = vld [vmem:[#allocation2 + $0xe8] sm:$0xff]  ;;  %v28_v47 = vld [vmem:[%s666_s0] sm:$0x3] }
  0x1d   :  { %511 = vmatprep.subr.bf16.mxu1 %v586_v0  ;;  %v503_v45 = vpack.c.bf16 %v44_v41, %v43_v40  ;;  %v524_v46 = vpack.c.bf16 %v137_v44, %v136_v43  ;;  %v138_v48 = vld [vmem:[#allocation2 + $0xf0] sm:$0xff]  ;;  %v139_v49 = vld [vmem:[#allocation2 + $0xf8] sm:$0xff]  ;;  %v220_v51 = vld [vmem:[#allocation2 + $0x100] sm:$0xff] }
  0x1e   :  { %489 = vmatpush3.bf16.msra.mxu0 %v488_v14  ;;  %v527_v50 = vpack.c.bf16 %v139_v49, %v138_v48  ;;  %v221_v52 = vld [vmem:[#allocation2 + $0x108] sm:$0xff]  ;;  %v222_v53 = vld [vmem:[#allocation2 + $0x110] sm:$0xff]  ;;  %v223_v55 = vld [vmem:[#allocation2 + $0x118] sm:$0xff] }
  0x1f   :  { %490 = vmatprep.subr.bf16.mxu0 %v586_v0  ;;  %v530_v54 = vpack.c.bf16 %v221_v52, %v220_v51  ;;  %v533_v56 = vpack.c.bf16 %v223_v55, %v222_v53  ;;  %v224_v57 = vld [vmem:[#allocation2 + $0x120] sm:$0xff]  ;;  %v225_v58 = vld [vmem:[#allocation2 + $0x128] sm:$0xff]  ;;  %v226_v60 = vld [vmem:[#allocation2 + $0x130] sm:$0xff] }
  0x20   :  { %513 = vmatpush3.bf16.msra.mxu1 %v512_v24  ;;  %v536_v59 = vpack.c.bf16 %v225_v58, %v224_v57  ;;  %v227_v61 = vld [vmem:[#allocation2 + $0x138] sm:$0xff]  ;;  %v228_v63 = vld [vmem:[#allocation2 + $0x140] sm:$0xff]  ;;  %v230_v3 = vld [vmem:[#allocation2 + $0x150] sm:$0xff] }
  0x21   :  { %514 = vmatprep.subr.bf16.mxu1 %v586_v0  ;;  %v539_v62 = vpack.c.bf16 %v227_v61, %v226_v60  ;;  %v231_v4 = vld [vmem:[#allocation2 + $0x158] sm:$0xff]  ;;  %v232_v6 = vld [vmem:[#allocation2 + $0x160] sm:$0xff]  ;;  %v233_v7 = vld [vmem:[#allocation2 + $0x168] sm:$0xff] }
  0x22   :  { %492 = vmatpush3.bf16.msra.mxu0 %v491_v21  ;;  %v545_v5 = vpack.c.bf16 %v231_v4, %v230_v3  ;;  %v548_v8 = vpack.c.bf16 %v233_v7, %v232_v6  ;;  %v320_v9 = vld [vmem:[%s668_s2] ss:$0 sm:$0xff]  ;;  %v234_v14 = vld [vmem:[#allocation2 + $0x170] sm:$0xff]  ;;  %v235_v15 = vld [vmem:[#allocation2 + $0x178] sm:$0xff] }
  0x23   :  { %493 = vmatprep.subr.bf16.mxu0 %v586_v0  ;;  %v551_v16 = vpack.c.bf16 %v235_v15, %v234_v14  ;;  %v322_v17 = vld [vmem:[%s668_s2 + $0x1] ss:$0 sm:$0xff]  ;;  %v324_v21 = vld [vmem:[%s668_s2 + $0x2] ss:$0 sm:$0xff] }
  0x24   :  { %516 = vmatpush3.bf16.msra.mxu1 %v515_v30 }
  0x25   :  { %517 = vmatprep.subr.bf16.mxu1 %v586_v0 }
  0x26   :  { %495 = vmatpush3.bf16.msra.mxu0 %v494_v27 }
  0x27   :  { %496 = vmatprep.subr.bf16.mxu0 %v586_v0 }
  0x28   :  { %519 = vmatpush3.bf16.msra.mxu1 %v518_v36 }
  0x29   :  { %520 = vmatprep.subr.bf16.mxu1 %v586_v0 }
  0x2a   :  { %498 = vmatpush3.bf16.msra.mxu0 %v497_v33 }
  0x2b   :  { %499 = vmatprep.subr.bf16.mxu0 %v586_v0 }
  0x2c   :  { %522 = vmatpush3.bf16.msra.mxu1 %v521_v42 }
  0x2d   :  { %523 = vmatprep.subr.bf16.mxu1 %v586_v0 }
  0x2e   :  { %501 = vmatpush3.bf16.msra.mxu0 %v500_v39 }
  0x2f   :  { %502 = vmatprep.subr.bf16.mxu0 %v586_v0 }
  0x30   :  { %525 = vmatpush3.bf16.msra.mxu1 %v524_v46 }
  0x31   :  { %526 = vmatprep.subr.bf16.mxu1 %v586_v0 }
  0x32   :  { %504 = vmatpush3.bf16.msra.mxu0 %v503_v45 }
  0x33   :  { %529 = vmatprep.subr.bf16.mxu0 %v586_v0 }
  0x34   :  { %528 = vmatpush3.bf16.msra.mxu1 %v527_v50 }
  0x35   :  { %409 = vmatmul.mubr.f32.vlgmr.msra.gmra.mrb[0].mxu0 %v28_v47 }
  0x36   :  { %478 = vmatprep.mubr.msk.f32.mxu0 %vm587_vm0, %v588_v1  ;;  %531 = vmatpush3.bf16.msra.mxu0 %v530_v54  ;;  %v229_v1 = vld [vmem:[#allocation2 + $0x148] sm:$0xff] }
  0x37   :  { %532 = vmatprep.subr.bf16.mxu0 %v586_v0  ;;  %v542_v2 = vpack.c.bf16 %v229_v1, %v228_v63 }
  0x3a   :  { %534 = vmatpush3.bf16.msra.mxu0 %v533_v56 }
  0x3b   :  { %535 = vmatprep.subr.bf16.mxu0 %v586_v0 }
  0x3e   :  { %537 = vmatpush3.bf16.msra.mxu0 %v536_v59 }
  0x3f   :  { %538 = vmatprep.subr.bf16.mxu0 %v586_v0 }
  0x42   :  { %540 = vmatpush3.bf16.msra.mxu0 %v539_v62 }
  0x43   :  { %541 = vmatprep.subr.bf16.mxu0 %v586_v0 }
  0x46   :  { %543 = vmatpush3.bf16.msra.mxu0 %v542_v2 }
  0x47   :  { %544 = vmatprep.subr.bf16.mxu0 %v586_v0 }
  0x4a   :  { %546 = vmatpush3.bf16.msra.mxu0 %v545_v5 }
  0x4b   :  { %547 = vmatprep.subr.bf16.mxu0 %v586_v0 }
  0x4e   :  { %549 = vmatpush3.bf16.msra.mxu0 %v548_v8 }
  0x4f   :  { %550 = vmatprep.subr.bf16.mxu0 %v586_v0 }
  0x52   :  { %552 = vmatpush3.bf16.msra.mxu0 %v551_v16 }
 0x108   :  { %v118_v10 = vpop.f32.mrb[0].mxu0 }
 0x109   :  { %v119_v11 = vadd.f32 %v320_v9, %v118_v10  ;;  %v410_v12 = vpop.f32.mrb[1].mxu0 }
 0x10b   :  { %v122_v13 = vmax.f32 %v119_v11, 0.0 }
 0x10d   :  { %444 = vmatmul.mubr.f32.vlgmr.msra.gmra.mrb[0].mxu1 %v122_v13 }
 0x1e0   :  { %v214_v18 = vpop.f32.mrb[0].mxu1 }
 0x1e1   :  { %v215_v19 = vadd.f32 %v322_v17, %v214_v18  ;;  %v445_v0 = vpop.f32.mrb[1].mxu1 }
 0x1e3   :  { %v218_v20 = vmax.f32 %v215_v19, 0.0 }
 0x1e5   :  { %479 = vmatmul.mubr.f32.vlgmr.msra.gmra.mrb[2].mxu0 %v218_v20 }
 0x2b8   :  { %v310_v22 = vpop.f32.mrb[2].mxu0 }
 0x2b9   :  { %v311_v23 = vadd.f32 %v324_v21, %v310_v22  ;;  %v480_v24 = vpop.f32.mrb[3].mxu0 }
 0x2bb   :  { %314 = vst [vmem:[%s669_s3] sm:$0x3] %v311_v23 }
 0x2bc   :  { %319 = vsyncpa [#allocation3], 1 }

</bundles_post_ra>
